<compile_context>
chip_gen: v6e
topology: v6e:2x2x1
jax: 0.10.0
libtpu: 0.0.40
codegen_flags: <defaults>
</compile_context>

<pallas_src>
import functools

import jax
import jax.numpy as jnp
from jax.experimental import pallas as pl
from jax.experimental.pallas import tpu as pltpu


def _rnn_fused_kernel(time_chunk, interleave,
                      u_ref, b_out_ref, w_hh_hbm, w_out_hbm, y_ref,
                      w_hh_vmem, w_out_vmem, h_scratch, dma_sems):
    """Runs `time_chunk` RNN steps + the fused output Linear per grid iteration.

    Grid = (batch_blocks [parallel], time_chunks [arbitrary/sequential]).

    u_ref:      (Tc, Bc, H)  pre-projected inputs u_t = x_t @ W_ih^T + b_ih + b_hh
    b_out_ref:  (1, O)       output-linear bias (fp32)
    w_hh_hbm:   (H, H)       recurrent weight, right-multiply form, memory_space=ANY
    w_out_hbm:  (H, O)       output-linear weight, right-multiply form, memory_space=ANY
    y_ref:      (Tc, Bc, O)  fused Linear outputs (kernel output)
    w_hh_vmem:  (H, H)       single-buffered VMEM-resident copy of W_hh^T
    w_out_vmem: (H, O)       single-buffered VMEM-resident copy of W_out^T
    h_scratch:  (interleave, Bc // interleave, H)  fp32 hidden-state carry
    dma_sems:   (2,)         DMA completion semaphores for the weight copies
    """
    t_chunk = pl.program_id(1)

    cp_hh = pltpu.make_async_copy(w_hh_hbm, w_hh_vmem, dma_sems.at[0])
    cp_out = pltpu.make_async_copy(w_out_hbm, w_out_vmem, dma_sems.at[1])

    @pl.when(t_chunk == 0)
    def _():
        # Load both weights once per batch block (single-buffered) and reset the
        # hidden-state carry; the zeroing overlaps with the DMAs.
        cp_hh.start()
        cp_out.start()
        h_scratch[...] = jnp.zeros_like(h_scratch)
        cp_hh.wait()
        cp_out.wait()

    w_hh = w_hh_vmem[...]
    w_out = w_out_vmem[...]
    b_out = b_out_ref[...].astype(jnp.float32)             # (1, O)

    if interleave == 1:
        h = h_scratch[0]                                    # fp32 carry (Bc, H)
        # Fully unrolled short time loop with static indices: only the serial
        # h @ W_hh matmul remains on the recurrent critical path; the output
        # Linear matmul is independent and fills MXU idle cycles.
        for i in range(time_chunk):
            pre = u_ref[i].astype(jnp.float32) + jnp.dot(
                h.astype(w_hh.dtype), w_hh, preferred_element_type=jnp.float32)
            h = jnp.maximum(pre, 0.0)                       # relu nonlinearity
            y = jnp.dot(h.astype(w_out.dtype), w_out,
                        preferred_element_type=jnp.float32) + b_out
            y_ref[i] = y.astype(y_ref.dtype)
        h_scratch[0] = h
    else:
        # Two independent recurrence chains (the two halves of the batch block)
        # interleaved so one chain's matmul hides the other's MXU-result /
        # add / relu latency on the serial dependency.
        bh = h_scratch.shape[1]
        h0 = h_scratch[0]
        h1 = h_scratch[1]
        for i in range(time_chunk):
            u_i = u_ref[i].astype(jnp.float32)
            p0 = jnp.dot(h0.astype(w_hh.dtype), w_hh,
                         preferred_element_type=jnp.float32)
            p1 = jnp.dot(h1.astype(w_hh.dtype), w_hh,
                         preferred_element_type=jnp.float32)
            h0 = jnp.maximum(u_i[:bh] + p0, 0.0)
            h1 = jnp.maximum(u_i[bh:] + p1, 0.0)
            y0 = jnp.dot(h0.astype(w_out.dtype), w_out,
                         preferred_element_type=jnp.float32) + b_out
            y1 = jnp.dot(h1.astype(w_out.dtype), w_out,
                         preferred_element_type=jnp.float32) + b_out
            y_ref[i, :bh] = y0.astype(y_ref.dtype)
            y_ref[i, bh:] = y1.astype(y_ref.dtype)
        h_scratch[0] = h0
        h_scratch[1] = h1


def _round_up(x, m):
    return ((x + m - 1) // m) * m


@functools.partial(
    jax.jit, static_argnames=("time_chunk", "batch_block", "compute_dtype"))
def simple_rnn_forward(x, w_ih, w_hh, b_ih, b_hh, w_out, b_out,
                       *, time_chunk=32, batch_block=None,
                       compute_dtype=jnp.float32):
    """x: (B, T, I) float32.  Returns (B, T, O) float32.

    PyTorch weight conventions: w_ih (H, I), w_hh (H, H), b_ih (H,), b_hh (H,),
    w_out (O, H), b_out (O,).
    """
    B, T, I = x.shape
    H = w_hh.shape[0]
    O = w_out.shape[0]
    cd = jnp.dtype(compute_dtype)
    itemsize = cd.itemsize

    LANE = 128
    sub = 16 if cd == jnp.dtype(jnp.bfloat16) else 8

    # ---- pad feature dims to full lanes, batch to full sublanes -------------
    H_pad = _round_up(H, LANE)
    O_pad = _round_up(O, LANE)
    B_pad = _round_up(B, sub)

    # ---- batch-block selection ----------------------------------------------
    if batch_block is None:
        bb = min(B_pad, 256)
        while B_pad % bb != 0:
            bb -= sub
        # Prefer >= 2 batch blocks (never pad just for it) so v7x megacore can
        # shard the independent per-sequence recurrences across its two cores.
        if bb == B_pad and B_pad >= 2 * sub and (B_pad // 2) % sub == 0:
            bb = B_pad // 2
    else:
        bb = _round_up(int(batch_block), sub)
        B_pad = _round_up(B_pad, bb)

    # ---- time-chunk selection (pad T rather than degrade the chunk size) ----
    tc = max(1, min(int(time_chunk), T))

    # ---- VMEM budget: clamp to physical per-core VMEM (v7x = 64 MiB) --------
    try:
        phys_vmem = int(pltpu.get_tpu_info().vmem_capacity_bytes)
    except Exception:
        phys_vmem = 64 * 2**20          # conservative fallback (v7x per-core)
    budget = int(phys_vmem * 0.85)

    def vmem_needed(tc_, bb_):
        return (H_pad * H_pad * itemsize             # resident W_hh^T (1x buffered)
                + H_pad * O_pad * itemsize           # resident W_out^T (1x buffered)
                + 2 * tc_ * bb_ * H_pad * itemsize   # double-buffered u chunks
                + 2 * tc_ * bb_ * O_pad * itemsize   # double-buffered y chunks
                + 2 * O_pad * 4                      # b_out
                + bb_ * H_pad * 4)                   # fp32 hidden-state carry

    while vmem_needed(tc, bb) > budget and tc > 1:
        tc = max(1, tc // 2)
    while (vmem_needed(tc, bb) > budget and bb > sub
           and (bb // 2) % sub == 0 and B_pad % (bb // 2) == 0):
        bb //= 2

    T_pad = _round_up(T, tc)
    nb, nt = B_pad // bb, T_pad // tc

    # Interleave two independent recurrence chains when each half of the batch
    # block stays sublane-aligned.
    interleave = 2 if bb % (2 * sub) == 0 else 1

    vmem_limit = int(min(int(phys_vmem * 0.98),
                         max(32 * 2**20, vmem_needed(tc, bb) + 8 * 2**20)))

    # ---- hoisted non-recurrent work: one big input-projection matmul --------
    # Produces the time-major (T, B, H_pad) slab directly (layout change fused
    # into the matmul output; no standalone HBM transpose pass). Both RNN
    # biases are folded in. No Precision.HIGHEST: native bf16 for bf16 compute,
    # otherwise 3-pass bf16 (HIGH) which is ~f32-accurate and MXU-friendly.
    w_ih_p = jnp.pad(w_ih, ((0, H_pad - H), (0, 0))).astype(cd)
    bias = jnp.pad(b_ih + b_hh, (0, H_pad - H)).astype(jnp.float32)
    proj_precision = (None if cd == jnp.dtype(jnp.bfloat16)
                      else jax.lax.Precision.HIGH)
    u = jnp.einsum("bti,hi->tbh", x.astype(cd), w_ih_p,
                   precision=proj_precision,
                   preferred_element_type=jnp.float32)
    u = (u + bias).astype(cd)                                    # (T, B, H_pad)
    u = jnp.pad(u, ((0, T_pad - T), (0, B_pad - B), (0, 0)))     # zero-pad T, B

    w_hh_t = jnp.pad(w_hh.T, ((0, H_pad - H), (0, H_pad - H))).astype(cd)
    w_out_t = jnp.pad(w_out.T, ((0, H_pad - H), (0, O_pad - O))).astype(cd)
    b_out_2d = jnp.pad(b_out, (0, O_pad - O)).astype(jnp.float32).reshape(1, O_pad)

    y_tm = pl.pallas_call(
        functools.partial(_rnn_fused_kernel, tc, interleave),
        out_shape=jax.ShapeDtypeStruct((T_pad, B_pad, O_pad), cd),
        grid_spec=pltpu.PrefetchScalarGridSpec(
            num_scalar_prefetch=0,
            grid=(nb, nt),                                         # (batch, time)
            in_specs=[
                pl.BlockSpec((tc, bb, H_pad), lambda b, t: (t, b, 0)),   # u chunk
                pl.BlockSpec((1, O_pad), lambda b, t: (0, 0)),           # b_out
                pl.BlockSpec(memory_space=pl.ANY),                       # W_hh^T (HBM)
                pl.BlockSpec(memory_space=pl.ANY),                       # W_out^T (HBM)
            ],
            out_specs=pl.BlockSpec((tc, bb, O_pad), lambda b, t: (t, b, 0)),
            scratch_shapes=[
                pltpu.VMEM((H_pad, H_pad), cd),              # resident W_hh^T
                pltpu.VMEM((H_pad, O_pad), cd),              # resident W_out^T
                pltpu.VMEM((interleave, bb // interleave, H_pad), jnp.float32),
                pltpu.SemaphoreType.DMA((2,)),               # weight-load semaphores
            ],
        ),
        compiler_params=pltpu.CompilerParams(
            # batch blocks are independent (megacore-shardable on v7x);
            # the time axis carries the recurrence -> sequential.
            dimension_semantics=("parallel", "arbitrary"),
            vmem_limit_bytes=vmem_limit,
        ),
    )(u, b_out_2d, w_hh_t, w_out_t)

    # Output Linear already fused into the kernel: just drop the padding and go
    # back to batch_first layout (tiny (T,B,O) transpose; O << H).
    y = jnp.transpose(y_tm[:T, :B, :O], (1, 0, 2))
    return y.astype(x.dtype)


def _reference_forward(x, w_ih, w_hh, b_ih, b_hh, w_out, b_out):
    """Pure-JAX reference matching torch.nn.RNN(relu, batch_first) + Linear."""
    B = x.shape[0]
    H = w_hh.shape[0]
    hi = jax.lax.Precision.HIGHEST

    def step(h, x_t):
        h_new = jnp.maximum(
            jnp.dot(x_t, w_ih.T, precision=hi) + b_ih
            + jnp.dot(h, w_hh.T, precision=hi) + b_hh, 0.0)
        return h_new, h_new

    h0 = jnp.zeros((B, H), dtype=jnp.float32)
    _, hs = jax.lax.scan(step, h0, jnp.transpose(x, (1, 0, 2)))
    hs = jnp.transpose(hs, (1, 0, 2))                    # (B, T, H)
    return jnp.dot(hs, w_out.T, precision=hi) + b_out


if __name__ == "__main__":
    # Small deterministic problem: batch=2, seq=8, input=16, hidden=32, output=4
    B, T, I, H, O = 2, 8, 16, 32, 4

    key = jax.random.PRNGKey(0)
    keys = jax.random.split(key, 7)

    # PyTorch-style uniform(-1/sqrt(H), 1/sqrt(H)) init, deterministic.
    bound = 1.0 / float(jnp.sqrt(jnp.float32(H)))
    w_ih = jax.random.uniform(keys[0], (H, I), jnp.float32, -bound, bound)
    w_hh = jax.random.uniform(keys[1], (H, H), jnp.float32, -bound, bound)
    b_ih = jax.random.uniform(keys[2], (H,), jnp.float32, -bound, bound)
    b_hh = jax.random.uniform(keys[3], (H,), jnp.float32, -bound, bound)
    w_out = jax.random.uniform(keys[4], (O, H), jnp.float32, -bound, bound)
    b_out = jax.random.uniform(keys[5], (O,), jnp.float32, -bound, bound)

    x = jax.random.normal(keys[6], (B, T, I), jnp.float32)

    y = simple_rnn_forward(x, w_ih, w_hh, b_ih, b_hh, w_out, b_out)
    y = jax.block_until_ready(y)

    y_ref = _reference_forward(x, w_ih, w_hh, b_ih, b_hh, w_out, b_out)
    assert y.shape == (B, T, O), y.shape
    max_err = float(jnp.max(jnp.abs(y - y_ref)))
    assert jnp.allclose(y, y_ref, atol=1e-3, rtol=1e-3), max_err

    print("KERNEL_OK")
</pallas_src>

<mosaic_0001>
module attributes {stable_mosaic.version = 11 : i64} {
  func.func @_rnn_fused_kernel(%arg0: i32, %arg1: i32, %arg2: memref<8x8x128xf32, #tpu.memory_space<vmem>>, %arg3: memref<1x128xf32, #tpu.memory_space<vmem>>, %arg4: memref<128x128xf32, #tpu.memory_space<any>>, %arg5: memref<128x128xf32, #tpu.memory_space<any>>, %arg6: memref<8x8x128xf32, #tpu.memory_space<vmem>>, %arg7: memref<128x128xf32, #tpu.memory_space<vmem>>, %arg8: memref<128x128xf32, #tpu.memory_space<vmem>>, %arg9: memref<1x8x128xf32, #tpu.memory_space<vmem>>, %arg10: memref<2x!tpu.dma_semaphore, #tpu.memory_space<semaphore_mem>>) attributes {dimension_semantics = [#tpu.dimension_semantics<parallel>, #tpu.dimension_semantics<arbitrary>], iteration_bounds = array<i64: 1, 1>, scalar_prefetch = 0 : i64, scratch_operands = 4 : i64, tpu.core_type = #tpu.core_type<tc>, window_params = [{transform_indices = @transform_0, window_bounds = array<i64: 8, 8, 128>}, {pipeline_mode = #tpu.pipeline_mode<synchronous>, transform_indices = @transform_1, window_bounds = array<i64: 1, 128>}, {}, {}, {transform_indices = @transform_4, window_bounds = array<i64: 8, 8, 128>}]} {
    %c0_i32 = arith.constant 0 : i32
    %0 = arith.cmpi eq, %arg1, %c0_i32 : i32
    %1 = arith.extui %0 : i1 to i32
    %c0_i32_0 = arith.constant 0 : i32
    %c1_i32 = arith.constant 1 : i32
    %c0_i32_1 = arith.constant 0 : i32
    %2 = arith.cmpi ne, %1, %c0_i32_1 : i32
    scf.if %2 {
      %107 = tpu.memref_slice %arg10[%c0_i32_0] : memref<2x!tpu.dma_semaphore, #tpu.memory_space<semaphore_mem>> -> memref<1x!tpu.dma_semaphore, #tpu.memory_space<semaphore_mem>>
      %108 = tpu.memref_squeeze %107 : memref<1x!tpu.dma_semaphore, #tpu.memory_space<semaphore_mem>> -> memref<!tpu.dma_semaphore, #tpu.memory_space<semaphore_mem>>
      tpu.enqueue_dma source(%arg4 : memref<128x128xf32, #tpu.memory_space<any>>) target(%arg7 : memref<128x128xf32, #tpu.memory_space<vmem>>) target_semaphore(%108 : memref<!tpu.dma_semaphore, #tpu.memory_space<semaphore_mem>>)
      %109 = tpu.memref_slice %arg10[%c1_i32] : memref<2x!tpu.dma_semaphore, #tpu.memory_space<semaphore_mem>> -> memref<1x!tpu.dma_semaphore, #tpu.memory_space<semaphore_mem>>
      %110 = tpu.memref_squeeze %109 : memref<1x!tpu.dma_semaphore, #tpu.memory_space<semaphore_mem>> -> memref<!tpu.dma_semaphore, #tpu.memory_space<semaphore_mem>>
      tpu.enqueue_dma source(%arg5 : memref<128x128xf32, #tpu.memory_space<any>>) target(%arg8 : memref<128x128xf32, #tpu.memory_space<vmem>>) target_semaphore(%110 : memref<!tpu.dma_semaphore, #tpu.memory_space<semaphore_mem>>)
      %cst_77 = arith.constant 0.000000e+00 : f32
      %111 = vector.broadcast %cst_77 : f32 to vector<1x8x128xf32>
      %c0_78 = arith.constant 0 : index
      %c0_79 = arith.constant 0 : index
      %c0_80 = arith.constant 0 : index
      %112 = vector.load %arg9[%c0_78, %c0_79, %c0_80] : memref<1x8x128xf32, #tpu.memory_space<vmem>>, vector<1x8x128xf32>
      tpu.vector_store %arg9[%c0_78, %c0_79, %c0_80], %111 {strides = array<i32>} : memref<1x8x128xf32, #tpu.memory_space<vmem>>, vector<1x8x128xf32>,
      %113 = tpu.memref_slice %arg10[%c0_i32_0] : memref<2x!tpu.dma_semaphore, #tpu.memory_space<semaphore_mem>> -> memref<1x!tpu.dma_semaphore, #tpu.memory_space<semaphore_mem>>
      %114 = tpu.memref_squeeze %113 : memref<1x!tpu.dma_semaphore, #tpu.memory_space<semaphore_mem>> -> memref<!tpu.dma_semaphore, #tpu.memory_space<semaphore_mem>>
      tpu.wait_dma2 semaphore(%114 : memref<!tpu.dma_semaphore, #tpu.memory_space<semaphore_mem>>) src(%arg4 : memref<128x128xf32, #tpu.memory_space<any>>) dst(%arg7 : memref<128x128xf32, #tpu.memory_space<vmem>>)
      %115 = tpu.memref_slice %arg10[%c1_i32] : memref<2x!tpu.dma_semaphore, #tpu.memory_space<semaphore_mem>> -> memref<1x!tpu.dma_semaphore, #tpu.memory_space<semaphore_mem>>
      %116 = tpu.memref_squeeze %115 : memref<1x!tpu.dma_semaphore, #tpu.memory_space<semaphore_mem>> -> memref<!tpu.dma_semaphore, #tpu.memory_space<semaphore_mem>>
      tpu.wait_dma2 semaphore(%116 : memref<!tpu.dma_semaphore, #tpu.memory_space<semaphore_mem>>) src(%arg5 : memref<128x128xf32, #tpu.memory_space<any>>) dst(%arg8 : memref<128x128xf32, #tpu.memory_space<vmem>>)
    } else {
    }
    %c0 = arith.constant 0 : index
    %c0_2 = arith.constant 0 : index
    %3 = vector.load %arg7[%c0, %c0_2] : memref<128x128xf32, #tpu.memory_space<vmem>>, vector<128x128xf32>
    %c0_3 = arith.constant 0 : index
    %c0_4 = arith.constant 0 : index
    %4 = vector.load %arg8[%c0_3, %c0_4] : memref<128x128xf32, #tpu.memory_space<vmem>>, vector<128x128xf32>
    %c0_5 = arith.constant 0 : index
    %c0_6 = arith.constant 0 : index
    %5 = vector.load %arg3[%c0_5, %c0_6] : memref<1x128xf32, #tpu.memory_space<vmem>>, vector<1x128xf32>
    %c0_7 = arith.constant 0 : index
    %c0_8 = arith.constant 0 : index
    %c0_9 = arith.constant 0 : index
    %6 = vector.load %arg9[%c0_7, %c0_8, %c0_9] : memref<1x8x128xf32, #tpu.memory_space<vmem>>, vector<1x8x128xf32>
    %7 = vector.shape_cast %6 : vector<1x8x128xf32> to vector<8x128xf32>
    %c0_10 = arith.constant 0 : index
    %c0_11 = arith.constant 0 : index
    %c0_12 = arith.constant 0 : index
    %8 = vector.load %arg2[%c0_10, %c0_11, %c0_12] : memref<8x8x128xf32, #tpu.memory_space<vmem>>, vector<1x8x128xf32>
    %9 = vector.shape_cast %8 : vector<1x8x128xf32> to vector<8x128xf32>
    %cst = arith.constant dense<0.000000e+00> : vector<8x128xf32>
    %10 = tpu.matmul %7, %3, %cst {dimension_numbers = #tpu.dot_dimension_numbers<[1], [0], [0], [1], [0, 0, 1, 1], [], []>} : vector<8x128xf32>, vector<128x128xf32>, vector<8x128xf32> -> vector<8x128xf32>
    %11 = arith.addf %9, %10 : vector<8x128xf32>
    %cst_13 = arith.constant 0.000000e+00 : f32
    %12 = vector.broadcast %cst_13 : f32 to vector<8x128xf32>
    %13 = arith.maximumf %11, %12 : vector<8x128xf32>
    %cst_14 = arith.constant dense<0.000000e+00> : vector<8x128xf32>
    %14 = tpu.matmul %13, %4, %cst_14 {dimension_numbers = #tpu.dot_dimension_numbers<[1], [0], [0], [1], [0, 0, 1, 1], [], []>} : vector<8x128xf32>, vector<128x128xf32>, vector<8x128xf32> -> vector<8x128xf32>
    %15 = vector.broadcast %5 : vector<1x128xf32> to vector<8x128xf32>
    %16 = arith.addf %14, %15 : vector<8x128xf32>
    %c0_15 = arith.constant 0 : index
    %c0_16 = arith.constant 0 : index
    %c0_17 = arith.constant 0 : index
    %17 = vector.load %arg6[%c0_15, %c0_16, %c0_17] : memref<8x8x128xf32, #tpu.memory_space<vmem>>, vector<1x8x128xf32>
    %18 = vector.shape_cast %17 : vector<1x8x128xf32> to vector<8x128xf32>
    %19 = vector.shape_cast %16 : vector<8x128xf32> to vector<1x8x128xf32>
    tpu.vector_store %arg6[%c0_15, %c0_16, %c0_17], %19 {strides = array<i32>} : memref<8x8x128xf32, #tpu.memory_space<vmem>>, vector<1x8x128xf32>,
    %c1 = arith.constant 1 : index
    %c0_18 = arith.constant 0 : index
    %c0_19 = arith.constant 0 : index
    %20 = vector.load %arg2[%c1, %c0_18, %c0_19] : memref<8x8x128xf32, #tpu.memory_space<vmem>>, vector<1x8x128xf32>
    %21 = vector.shape_cast %20 : vector<1x8x128xf32> to vector<8x128xf32>
    %cst_20 = arith.constant dense<0.000000e+00> : vector<8x128xf32>
    %22 = tpu.matmul %13, %3, %cst_20 {dimension_numbers = #tpu.dot_dimension_numbers<[1], [0], [0], [1], [0, 0, 1, 1], [], []>} : vector<8x128xf32>, vector<128x128xf32>, vector<8x128xf32> -> vector<8x128xf32>
    %23 = arith.addf %21, %22 : vector<8x128xf32>
    %cst_21 = arith.constant 0.000000e+00 : f32
    %24 = vector.broadcast %cst_21 : f32 to vector<8x128xf32>
    %25 = arith.maximumf %23, %24 : vector<8x128xf32>
    %cst_22 = arith.constant dense<0.000000e+00> : vector<8x128xf32>
    %26 = tpu.matmul %25, %4, %cst_22 {dimension_numbers = #tpu.dot_dimension_numbers<[1], [0], [0], [1], [0, 0, 1, 1], [], []>} : vector<8x128xf32>, vector<128x128xf32>, vector<8x128xf32> -> vector<8x128xf32>
    %27 = vector.broadcast %5 : vector<1x128xf32> to vector<8x128xf32>
    %28 = arith.addf %26, %27 : vector<8x128xf32>
    %c1_23 = arith.constant 1 : index
    %c0_24 = arith.constant 0 : index
    %c0_25 = arith.constant 0 : index
    %29 = vector.load %arg6[%c1_23, %c0_24, %c0_25] : memref<8x8x128xf32, #tpu.memory_space<vmem>>, vector<1x8x128xf32>
    %30 = vector.shape_cast %29 : vector<1x8x128xf32> to vector<8x128xf32>
    %31 = vector.shape_cast %28 : vector<8x128xf32> to vector<1x8x128xf32>
    tpu.vector_store %arg6[%c1_23, %c0_24, %c0_25], %31 {strides = array<i32>} : memref<8x8x128xf32, #tpu.memory_space<vmem>>, vector<1x8x128xf32>,
    %c2 = arith.constant 2 : index
    %c0_26 = arith.constant 0 : index
    %c0_27 = arith.constant 0 : index
    %32 = vector.load %arg2[%c2, %c0_26, %c0_27] : memref<8x8x128xf32, #tpu.memory_space<vmem>>, vector<1x8x128xf32>
    %33 = vector.shape_cast %32 : vector<1x8x128xf32> to vector<8x128xf32>
    %cst_28 = arith.constant dense<0.000000e+00> : vector<8x128xf32>
    %34 = tpu.matmul %25, %3, %cst_28 {dimension_numbers = #tpu.dot_dimension_numbers<[1], [0], [0], [1], [0, 0, 1, 1], [], []>} : vector<8x128xf32>, vector<128x128xf32>, vector<8x128xf32> -> vector<8x128xf32>
    %35 = arith.addf %33, %34 : vector<8x128xf32>
    %cst_29 = arith.constant 0.000000e+00 : f32
    %36 = vector.broadcast %cst_29 : f32 to vector<8x128xf32>
    %37 = arith.maximumf %35, %36 : vector<8x128xf32>
    %cst_30 = arith.constant dense<0.000000e+00> : vector<8x128xf32>
    %38 = tpu.matmul %37, %4, %cst_30 {dimension_numbers = #tpu.dot_dimension_numbers<[1], [0], [0], [1], [0, 0, 1, 1], [], []>} : vector<8x128xf32>, vector<128x128xf32>, vector<8x128xf32> -> vector<8x128xf32>
    %39 = vector.broadcast %5 : vector<1x128xf32> to vector<8x128xf32>
    %40 = arith.addf %38, %39 : vector<8x128xf32>
    %c2_31 = arith.constant 2 : index
    %c0_32 = arith.constant 0 : index
    %c0_33 = arith.constant 0 : index
    %41 = vector.load %arg6[%c2_31, %c0_32, %c0_33] : memref<8x8x128xf32, #tpu.memory_space<vmem>>, vector<1x8x128xf32>
    %42 = vector.shape_cast %41 : vector<1x8x128xf32> to vector<8x128xf32>
    %43 = vector.shape_cast %40 : vector<8x128xf32> to vector<1x8x128xf32>
    tpu.vector_store %arg6[%c2_31, %c0_32, %c0_33], %43 {strides = array<i32>} : memref<8x8x128xf32, #tpu.memory_space<vmem>>, vector<1x8x128xf32>,
    %c3 = arith.constant 3 : index
    %c0_34 = arith.constant 0 : index
    %c0_35 = arith.constant 0 : index
    %44 = vector.load %arg2[%c3, %c0_34, %c0_35] : memref<8x8x128xf32, #tpu.memory_space<vmem>>, vector<1x8x128xf32>
    %45 = vector.shape_cast %44 : vector<1x8x128xf32> to vector<8x128xf32>
    %cst_36 = arith.constant dense<0.000000e+00> : vector<8x128xf32>
    %46 = tpu.matmul %37, %3, %cst_36 {dimension_numbers = #tpu.dot_dimension_numbers<[1], [0], [0], [1], [0, 0, 1, 1], [], []>} : vector<8x128xf32>, vector<128x128xf32>, vector<8x128xf32> -> vector<8x128xf32>
    %47 = arith.addf %45, %46 : vector<8x128xf32>
    %cst_37 = arith.constant 0.000000e+00 : f32
    %48 = vector.broadcast %cst_37 : f32 to vector<8x128xf32>
    %49 = arith.maximumf %47, %48 : vector<8x128xf32>
    %cst_38 = arith.constant dense<0.000000e+00> : vector<8x128xf32>
    %50 = tpu.matmul %49, %4, %cst_38 {dimension_numbers = #tpu.dot_dimension_numbers<[1], [0], [0], [1], [0, 0, 1, 1], [], []>} : vector<8x128xf32>, vector<128x128xf32>, vector<8x128xf32> -> vector<8x128xf32>
    %51 = vector.broadcast %5 : vector<1x128xf32> to vector<8x128xf32>
    %52 = arith.addf %50, %51 : vector<8x128xf32>
    %c3_39 = arith.constant 3 : index
    %c0_40 = arith.constant 0 : index
    %c0_41 = arith.constant 0 : index
    %53 = vector.load %arg6[%c3_39, %c0_40, %c0_41] : memref<8x8x128xf32, #tpu.memory_space<vmem>>, vector<1x8x128xf32>
    %54 = vector.shape_cast %53 : vector<1x8x128xf32> to vector<8x128xf32>
    %55 = vector.shape_cast %52 : vector<8x128xf32> to vector<1x8x128xf32>
    tpu.vector_store %arg6[%c3_39, %c0_40, %c0_41], %55 {strides = array<i32>} : memref<8x8x128xf32, #tpu.memory_space<vmem>>, vector<1x8x128xf32>,
    %c4 = arith.constant 4 : index
    %c0_42 = arith.constant 0 : index
    %c0_43 = arith.constant 0 : index
    %56 = vector.load %arg2[%c4, %c0_42, %c0_43] : memref<8x8x128xf32, #tpu.memory_space<vmem>>, vector<1x8x128xf32>
    %57 = vector.shape_cast %56 : vector<1x8x128xf32> to vector<8x128xf32>
    %cst_44 = arith.constant dense<0.000000e+00> : vector<8x128xf32>
    %58 = tpu.matmul %49, %3, %cst_44 {dimension_numbers = #tpu.dot_dimension_numbers<[1], [0], [0], [1], [0, 0, 1, 1], [], []>} : vector<8x128xf32>, vector<128x128xf32>, vector<8x128xf32> -> vector<8x128xf32>
    %59 = arith.addf %57, %58 : vector<8x128xf32>
    %cst_45 = arith.constant 0.000000e+00 : f32
    %60 = vector.broadcast %cst_45 : f32 to vector<8x128xf32>
    %61 = arith.maximumf %59, %60 : vector<8x128xf32>
    %cst_46 = arith.constant dense<0.000000e+00> : vector<8x128xf32>
    %62 = tpu.matmul %61, %4, %cst_46 {dimension_numbers = #tpu.dot_dimension_numbers<[1], [0], [0], [1], [0, 0, 1, 1], [], []>} : vector<8x128xf32>, vector<128x128xf32>, vector<8x128xf32> -> vector<8x128xf32>
    %63 = vector.broadcast %5 : vector<1x128xf32> to vector<8x128xf32>
    %64 = arith.addf %62, %63 : vector<8x128xf32>
    %c4_47 = arith.constant 4 : index
    %c0_48 = arith.constant 0 : index
    %c0_49 = arith.constant 0 : index
    %65 = vector.load %arg6[%c4_47, %c0_48, %c0_49] : memref<8x8x128xf32, #tpu.memory_space<vmem>>, vector<1x8x128xf32>
    %66 = vector.shape_cast %65 : vector<1x8x128xf32> to vector<8x128xf32>
    %67 = vector.shape_cast %64 : vector<8x128xf32> to vector<1x8x128xf32>
    tpu.vector_store %arg6[%c4_47, %c0_48, %c0_49], %67 {strides = array<i32>} : memref<8x8x128xf32, #tpu.memory_space<vmem>>, vector<1x8x128xf32>,
    %c5 = arith.constant 5 : index
    %c0_50 = arith.constant 0 : index
    %c0_51 = arith.constant 0 : index
    %68 = vector.load %arg2[%c5, %c0_50, %c0_51] : memref<8x8x128xf32, #tpu.memory_space<vmem>>, vector<1x8x128xf32>
    %69 = vector.shape_cast %68 : vector<1x8x128xf32> to vector<8x128xf32>
    %cst_52 = arith.constant dense<0.000000e+00> : vector<8x128xf32>
    %70 = tpu.matmul %61, %3, %cst_52 {dimension_numbers = #tpu.dot_dimension_numbers<[1], [0], [0], [1], [0, 0, 1, 1], [], []>} : vector<8x128xf32>, vector<128x128xf32>, vector<8x128xf32> -> vector<8x128xf32>
    %71 = arith.addf %69, %70 : vector<8x128xf32>
    %cst_53 = arith.constant 0.000000e+00 : f32
    %72 = vector.broadcast %cst_53 : f32 to vector<8x128xf32>
    %73 = arith.maximumf %71, %72 : vector<8x128xf32>
    %cst_54 = arith.constant dense<0.000000e+00> : vector<8x128xf32>
    %74 = tpu.matmul %73, %4, %cst_54 {dimension_numbers = #tpu.dot_dimension_numbers<[1], [0], [0], [1], [0, 0, 1, 1], [], []>} : vector<8x128xf32>, vector<128x128xf32>, vector<8x128xf32> -> vector<8x128xf32>
    %75 = vector.broadcast %5 : vector<1x128xf32> to vector<8x128xf32>
    %76 = arith.addf %74, %75 : vector<8x128xf32>
    %c5_55 = arith.constant 5 : index
    %c0_56 = arith.constant 0 : index
    %c0_57 = arith.constant 0 : index
    %77 = vector.load %arg6[%c5_55, %c0_56, %c0_57] : memref<8x8x128xf32, #tpu.memory_space<vmem>>, vector<1x8x128xf32>
    %78 = vector.shape_cast %77 : vector<1x8x128xf32> to vector<8x128xf32>
    %79 = vector.shape_cast %76 : vector<8x128xf32> to vector<1x8x128xf32>
    tpu.vector_store %arg6[%c5_55, %c0_56, %c0_57], %79 {strides = array<i32>} : memref<8x8x128xf32, #tpu.memory_space<vmem>>, vector<1x8x128xf32>,
    %c6 = arith.constant 6 : index
    %c0_58 = arith.constant 0 : index
    %c0_59 = arith.constant 0 : index
    %80 = vector.load %arg2[%c6, %c0_58, %c0_59] : memref<8x8x128xf32, #tpu.memory_space<vmem>>, vector<1x8x128xf32>
    %81 = vector.shape_cast %80 : vector<1x8x128xf32> to vector<8x128xf32>
    %cst_60 = arith.constant dense<0.000000e+00> : vector<8x128xf32>
    %82 = tpu.matmul %73, %3, %cst_60 {dimension_numbers = #tpu.dot_dimension_numbers<[1], [0], [0], [1], [0, 0, 1, 1], [], []>} : vector<8x128xf32>, vector<128x128xf32>, vector<8x128xf32> -> vector<8x128xf32>
    %83 = arith.addf %81, %82 : vector<8x128xf32>
    %cst_61 = arith.constant 0.000000e+00 : f32
    %84 = vector.broadcast %cst_61 : f32 to vector<8x128xf32>
    %85 = arith.maximumf %83, %84 : vector<8x128xf32>
    %cst_62 = arith.constant dense<0.000000e+00> : vector<8x128xf32>
    %86 = tpu.matmul %85, %4, %cst_62 {dimension_numbers = #tpu.dot_dimension_numbers<[1], [0], [0], [1], [0, 0, 1, 1], [], []>} : vector<8x128xf32>, vector<128x128xf32>, vector<8x128xf32> -> vector<8x128xf32>
    %87 = vector.broadcast %5 : vector<1x128xf32> to vector<8x128xf32>
    %88 = arith.addf %86, %87 : vector<8x128xf32>
    %c6_63 = arith.constant 6 : index
    %c0_64 = arith.constant 0 : index
    %c0_65 = arith.constant 0 : index
    %89 = vector.load %arg6[%c6_63, %c0_64, %c0_65] : memref<8x8x128xf32, #tpu.memory_space<vmem>>, vector<1x8x128xf32>
    %90 = vector.shape_cast %89 : vector<1x8x128xf32> to vector<8x128xf32>
    %91 = vector.shape_cast %88 : vector<8x128xf32> to vector<1x8x128xf32>
    tpu.vector_store %arg6[%c6_63, %c0_64, %c0_65], %91 {strides = array<i32>} : memref<8x8x128xf32, #tpu.memory_space<vmem>>, vector<1x8x128xf32>,
    %c7 = arith.constant 7 : index
    %c0_66 = arith.constant 0 : index
    %c0_67 = arith.constant 0 : index
    %92 = vector.load %arg2[%c7, %c0_66, %c0_67] : memref<8x8x128xf32, #tpu.memory_space<vmem>>, vector<1x8x128xf32>
    %93 = vector.shape_cast %92 : vector<1x8x128xf32> to vector<8x128xf32>
    %cst_68 = arith.constant dense<0.000000e+00> : vector<8x128xf32>
    %94 = tpu.matmul %85, %3, %cst_68 {dimension_numbers = #tpu.dot_dimension_numbers<[1], [0], [0], [1], [0, 0, 1, 1], [], []>} : vector<8x128xf32>, vector<128x128xf32>, vector<8x128xf32> -> vector<8x128xf32>
    %95 = arith.addf %93, %94 : vector<8x128xf32>
    %cst_69 = arith.constant 0.000000e+00 : f32
    %96 = vector.broadcast %cst_69 : f32 to vector<8x128xf32>
    %97 = arith.maximumf %95, %96 : vector<8x128xf32>
    %cst_70 = arith.constant dense<0.000000e+00> : vector<8x128xf32>
    %98 = tpu.matmul %97, %4, %cst_70 {dimension_numbers = #tpu.dot_dimension_numbers<[1], [0], [0], [1], [0, 0, 1, 1], [], []>} : vector<8x128xf32>, vector<128x128xf32>, vector<8x128xf32> -> vector<8x128xf32>
    %99 = vector.broadcast %5 : vector<1x128xf32> to vector<8x128xf32>
    %100 = arith.addf %98, %99 : vector<8x128xf32>
    %c7_71 = arith.constant 7 : index
    %c0_72 = arith.constant 0 : index
    %c0_73 = arith.constant 0 : index
    %101 = vector.load %arg6[%c7_71, %c0_72, %c0_73] : memref<8x8x128xf32, #tpu.memory_space<vmem>>, vector<1x8x128xf32>
    %102 = vector.shape_cast %101 : vector<1x8x128xf32> to vector<8x128xf32>
    %103 = vector.shape_cast %100 : vector<8x128xf32> to vector<1x8x128xf32>
    tpu.vector_store %arg6[%c7_71, %c0_72, %c0_73], %103 {strides = array<i32>} : memref<8x8x128xf32, #tpu.memory_space<vmem>>, vector<1x8x128xf32>,
    %c0_74 = arith.constant 0 : index
    %c0_75 = arith.constant 0 : index
    %c0_76 = arith.constant 0 : index
    %104 = vector.load %arg9[%c0_74, %c0_75, %c0_76] : memref<1x8x128xf32, #tpu.memory_space<vmem>>, vector<1x8x128xf32>
    %105 = vector.shape_cast %104 : vector<1x8x128xf32> to vector<8x128xf32>
    %106 = vector.shape_cast %97 : vector<8x128xf32> to vector<1x8x128xf32>
    tpu.vector_store %arg9[%c0_74, %c0_75, %c0_76], %106 {strides = array<i32>} : memref<1x8x128xf32, #tpu.memory_space<vmem>>, vector<1x8x128xf32>,
    return
  }
  func.func @transform_0(%arg0: i32, %arg1: i32) -> (i32, i32, i32) {
    %c0_i32 = arith.constant 0 : i32
    %c0_i32_0 = arith.constant 0 : i32
    return %arg1, %arg0, %c0_i32 : i32, i32, i32
  }
  func.func @transform_1(%arg0: i32, %arg1: i32) -> (i32, i32) {
    %c0_i32 = arith.constant 0 : i32
    %c0_i32_0 = arith.constant 0 : i32
    %c0_i32_1 = arith.constant 0 : i32
    return %c0_i32, %c0_i32_0 : i32, i32
  }
  func.func @transform_4(%arg0: i32, %arg1: i32) -> (i32, i32, i32) {
    %c0_i32 = arith.constant 0 : i32
    %c0_i32_0 = arith.constant 0 : i32
    return %arg1, %arg0, %c0_i32 : i32, i32, i32
  }
}

</mosaic_0001>

<bundles_post_ra>
// kernel: simple_rnn_forward.1
= control target key start
LH: loop header
LB: loop body
LE: loop exit
PB: predicated region body
PF: predicated region fallthrough
CT: control target
= control target key end

     0   :  { %s3058_s0 = inlined_call_operand.vmem [shape: f32[8,8,128], index: 0, kind: input, shape index: {}]   ;;  %s3059_s1 = inlined_call_operand.vmem [shape: f32[1,128], index: 1, kind: input, shape index: {}]   ;;  %s3060_s2 = inlined_call_operand.vmem [shape: f32[128,128], index: 2, kind: input, shape index: {}]   ;;  %s3061_s3 = inlined_call_operand.vmem [shape: f32[128,128], index: 3, kind: input, shape index: {}]   ;;  %s3062_s4 = inlined_call_operand.vmem [shape: f32[8,8,128], index: 4, kind: output, shape index: {}]  }
   0x1   :  { %v2295_v0 = vld [vmem:[%s3060_s2] sm:$0xff]  ;;  %v2300_v1 = vld [vmem:[%s3060_s2 + $0x8] sm:$0xff]  ;;  %v2305_v2 = vld [vmem:[%s3060_s2 + $0x10] sm:$0xff] }
   0x2   :  { %v2310_v3 = vld [vmem:[%s3060_s2 + $0x18] sm:$0xff]  ;;  %v2315_v4 = vld [vmem:[%s3060_s2 + $0x20] sm:$0xff]  ;;  %v2320_v5 = vld [vmem:[%s3060_s2 + $0x28] sm:$0xff] }
   0x3   :  { %v2325_v6 = vld [vmem:[%s3060_s2 + $0x30] sm:$0xff]  ;;  %v2330_v7 = vld [vmem:[%s3060_s2 + $0x38] sm:$0xff]  ;;  %v2335_v8 = vld [vmem:[%s3060_s2 + $0x40] sm:$0xff] }
   0x4   :  { %v2340_v9 = vld [vmem:[%s3060_s2 + $0x48] sm:$0xff]  ;;  %v2345_v10 = vld [vmem:[%s3060_s2 + $0x50] sm:$0xff]  ;;  %v2350_v11 = vld [vmem:[%s3060_s2 + $0x58] sm:$0xff] }
   0x5   :  { %v2355_v12 = vld [vmem:[%s3060_s2 + $0x60] sm:$0xff]  ;;  %v2360_v13 = vld [vmem:[%s3060_s2 + $0x68] sm:$0xff]  ;;  %v2365_v14 = vld [vmem:[%s3060_s2 + $0x70] sm:$0xff] }
   0x6   :  { %v2370_v15 = vld [vmem:[%s3060_s2 + $0x78] sm:$0xff] }
   0x7   :  { %89 = vsyncadd [#allocation5], 2048  ;;  %v2375_v16 = vld [vmem:[%s3061_s3] sm:$0xff]  ;;  %v2380_v17 = vld [vmem:[%s3061_s3 + $0x8] sm:$0xff] }
   0x8   :  { %v2385_v18 = vld [vmem:[%s3061_s3 + $0x10] sm:$0xff]  ;;  %v2390_v19 = vld [vmem:[%s3061_s3 + $0x18] sm:$0xff]  ;;  %v2395_v20 = vld [vmem:[%s3061_s3 + $0x20] sm:$0xff] }
   0x9   :  { %v2400_v21 = vld [vmem:[%s3061_s3 + $0x28] sm:$0xff]  ;;  %v2405_v22 = vld [vmem:[%s3061_s3 + $0x30] sm:$0xff]  ;;  %v2410_v23 = vld [vmem:[%s3061_s3 + $0x38] sm:$0xff] }
   0xa   :  { %v2415_v24 = vld [vmem:[%s3061_s3 + $0x40] sm:$0xff]  ;;  %v2420_v25 = vld [vmem:[%s3061_s3 + $0x48] sm:$0xff]  ;;  %v2425_v26 = vld [vmem:[%s3061_s3 + $0x50] sm:$0xff] }
   0xb   :  { %v2430_v27 = vld [vmem:[%s3061_s3 + $0x58] sm:$0xff]  ;;  %v2435_v28 = vld [vmem:[%s3061_s3 + $0x60] sm:$0xff]  ;;  %v2440_v29 = vld [vmem:[%s3061_s3 + $0x68] sm:$0xff] }
   0xc   :  { %v2445_v30 = vld [vmem:[%s3061_s3 + $0x70] sm:$0xff]  ;;  %v2450_v31 = vld [vmem:[%s3061_s3 + $0x78] sm:$0xff] }
   0xd   :  { %163 = vsyncadd [#allocation5 + $0x1], 2048 }
   0xe   :  { %2261 = dma.done.wait [#allocation5], 2048 }
   0xf   :  { %2262 = vsyncadd [#allocation5], 4294965248 }
  0x10   :  { %2263 = dma.done.wait [#allocation5 + $0x1], 2048 }
  0x11   :  { %2264 = vsyncadd [#allocation5 + $0x1], 4294965248  ;;  %v2265_v32 = vmov 0.0   ;;  %vm2266_vm0 = vmmov 0   ;;  %v204_v33 = vld [vmem:[%s3058_s0] sm:$0xff]  ;;  %v1411_v39 = vld [vmem:[%s3058_s0 + $0x8] sm:$0xff] }
  0x12   :  { %1699 = vmatprep.subr.mxu0 %v2265_v32  ;;  %1731 = vmatprep.mubr.msk.f32.mxu0 %vm2266_vm0, %v2265_v32  ;;  %v2631_v38 = vld [vmem:[%s3059_s1] ss:$0 sm:$0xff]  ;;  %v1413_v47 = vld [vmem:[%s3058_s0 + $0x10] sm:$0xff]  ;;  %v1415_v55 = vld [vmem:[%s3058_s0 + $0x18] sm:$0xff] }
  0x13   :  { %1700 = vmatpush3.msra.mxu0 %v2370_v15  ;;  %1734 = vmatprep.subr.mxu1 %v2265_v32  ;;  %v1417_v63 = vld [vmem:[%s3058_s0 + $0x20] sm:$0xff] }
  0x14   :  { %1701 = vmatprep.subr.mxu0 %v2265_v32  ;;  %1735 = vmatpush3.msra.mxu1 %v2450_v31 }
  0x15   :  { %1702 = vmatpush3.msra.mxu0 %v2365_v14  ;;  %1736 = vmatprep.subr.mxu1 %v2265_v32 }
  0x16   :  { %1703 = vmatprep.subr.mxu0 %v2265_v32  ;;  %1737 = vmatpush3.msra.mxu1 %v2445_v30 }
  0x17   :  { %1704 = vmatpush3.msra.mxu0 %v2360_v13  ;;  %1738 = vmatprep.subr.mxu1 %v2265_v32 }
  0x18   :  { %1705 = vmatprep.subr.mxu0 %v2265_v32  ;;  %1739 = vmatpush3.msra.mxu1 %v2440_v29 }
  0x19   :  { %1706 = vmatpush3.msra.mxu0 %v2355_v12  ;;  %1740 = vmatprep.subr.mxu1 %v2265_v32 }
  0x1a   :  { %1707 = vmatprep.subr.mxu0 %v2265_v32  ;;  %1741 = vmatpush3.msra.mxu1 %v2435_v28 }
  0x1b   :  { %1708 = vmatpush3.msra.mxu0 %v2350_v11  ;;  %1742 = vmatprep.subr.mxu1 %v2265_v32 }
  0x1c   :  { %1709 = vmatprep.subr.mxu0 %v2265_v32  ;;  %1743 = vmatpush3.msra.mxu1 %v2430_v27 }
  0x1d   :  { %1710 = vmatpush3.msra.mxu0 %v2345_v10  ;;  %1744 = vmatprep.subr.mxu1 %v2265_v32 }
  0x1e   :  { %1711 = vmatprep.subr.mxu0 %v2265_v32  ;;  %1745 = vmatpush3.msra.mxu1 %v2425_v26 }
  0x1f   :  { %1712 = vmatpush3.msra.mxu0 %v2340_v9  ;;  %1746 = vmatprep.subr.mxu1 %v2265_v32 }
  0x20   :  { %1713 = vmatprep.subr.mxu0 %v2265_v32  ;;  %1747 = vmatpush3.msra.mxu1 %v2420_v25 }
  0x21   :  { %1714 = vmatpush3.msra.mxu0 %v2335_v8  ;;  %1748 = vmatprep.subr.mxu1 %v2265_v32 }
  0x22   :  { %1715 = vmatprep.subr.mxu0 %v2265_v32  ;;  %1749 = vmatpush3.msra.mxu1 %v2415_v24 }
  0x23   :  { %1716 = vmatpush3.msra.mxu0 %v2330_v7  ;;  %1750 = vmatprep.subr.mxu1 %v2265_v32 }
  0x24   :  { %1717 = vmatprep.subr.mxu0 %v2265_v32  ;;  %1751 = vmatpush3.msra.mxu1 %v2410_v23 }
  0x25   :  { %1718 = vmatpush3.msra.mxu0 %v2325_v6  ;;  %1752 = vmatprep.subr.mxu1 %v2265_v32 }
  0x26   :  { %1719 = vmatprep.subr.mxu0 %v2265_v32  ;;  %1753 = vmatpush3.msra.mxu1 %v2405_v22 }
  0x27   :  { %1720 = vmatpush3.msra.mxu0 %v2320_v5  ;;  %1754 = vmatprep.subr.mxu1 %v2265_v32 }
  0x28   :  { %1721 = vmatprep.subr.mxu0 %v2265_v32  ;;  %1755 = vmatpush3.msra.mxu1 %v2400_v21 }
  0x29   :  { %1722 = vmatpush3.msra.mxu0 %v2315_v4  ;;  %1756 = vmatprep.subr.mxu1 %v2265_v32 }
  0x2a   :  { %1723 = vmatprep.subr.mxu0 %v2265_v32  ;;  %1757 = vmatpush3.msra.mxu1 %v2395_v20 }
  0x2b   :  { %1724 = vmatpush3.msra.mxu0 %v2310_v3  ;;  %1758 = vmatprep.subr.mxu1 %v2265_v32 }
  0x2c   :  { %1725 = vmatprep.subr.mxu0 %v2265_v32  ;;  %1759 = vmatpush3.msra.mxu1 %v2390_v19 }
  0x2d   :  { %1726 = vmatpush3.msra.mxu0 %v2305_v2  ;;  %1760 = vmatprep.subr.mxu1 %v2265_v32 }
  0x2e   :  { %1727 = vmatprep.subr.mxu0 %v2265_v32  ;;  %1761 = vmatpush3.msra.mxu1 %v2385_v18 }
  0x2f   :  { %1728 = vmatpush3.msra.mxu0 %v2300_v1  ;;  %1762 = vmatprep.subr.mxu1 %v2265_v32 }
  0x30   :  { %1729 = vmatprep.subr.mxu0 %v2265_v32  ;;  %1763 = vmatpush3.msra.mxu1 %v2380_v17 }
  0x31   :  { %1730 = vmatpush3.msra.mxu0 %v2295_v0  ;;  %1764 = vmatprep.subr.mxu1 %v2265_v32 }
  0x32   :  { %1732 = vmatmul.mubr.f32.vlgmr.msra.gmra.mxu0 %v2265_v32  ;;  %1769 = vmatprep.subr.mxu0 %v2265_v32 }
  0x33   :  { %1770 = vmatpush3.msra.mxu0 %v2370_v15  ;;  %1765 = vmatpush3.msra.mxu1 %v2375_v16 }
  0x34   :  { %1771 = vmatprep.subr.mxu0 %v2265_v32  ;;  %1766 = vmatprep.mubr.msk.f32.mxu1 %vm2266_vm0, %v2265_v32 }
  0x35   :  { %1772 = vmatpush3.msra.mxu0 %v2365_v14  ;;  %1801 = vmatprep.mubr.msk.f32.mxu0 %vm2266_vm0, %v2265_v32 }
  0x36   :  { %1773 = vmatprep.subr.mxu0 %v2265_v32  ;;  %1804 = vmatprep.subr.mxu1 %v2265_v32 }
  0x37   :  { %1774 = vmatpush3.msra.mxu0 %v2360_v13 }
  0x38   :  { %1775 = vmatprep.subr.mxu0 %v2265_v32 }
  0x39   :  { %1776 = vmatpush3.msra.mxu0 %v2355_v12 }
  0x3a   :  { %1777 = vmatprep.subr.mxu0 %v2265_v32 }
  0x3b   :  { %1778 = vmatpush3.msra.mxu0 %v2350_v11 }
  0x3c   :  { %1779 = vmatprep.subr.mxu0 %v2265_v32 }
  0x3d   :  { %1780 = vmatpush3.msra.mxu0 %v2345_v10 }
  0x3e   :  { %1781 = vmatprep.subr.mxu0 %v2265_v32 }
  0x3f   :  { %1782 = vmatpush3.msra.mxu0 %v2340_v9 }
  0x40   :  { %1783 = vmatprep.subr.mxu0 %v2265_v32 }
  0x41   :  { %1784 = vmatpush3.msra.mxu0 %v2335_v8 }
  0x42   :  { %1785 = vmatprep.subr.mxu0 %v2265_v32 }
  0x43   :  { %1786 = vmatpush3.msra.mxu0 %v2330_v7 }
  0x44   :  { %1787 = vmatprep.subr.mxu0 %v2265_v32 }
  0x45   :  { %1788 = vmatpush3.msra.mxu0 %v2325_v6 }
  0x46   :  { %1789 = vmatprep.subr.mxu0 %v2265_v32 }
  0x47   :  { %1790 = vmatpush3.msra.mxu0 %v2320_v5 }
  0x48   :  { %1791 = vmatprep.subr.mxu0 %v2265_v32 }
  0x49   :  { %1792 = vmatpush3.msra.mxu0 %v2315_v4 }
  0x4a   :  { %1793 = vmatprep.subr.mxu0 %v2265_v32 }
  0x4b   :  { %1794 = vmatpush3.msra.mxu0 %v2310_v3 }
  0x4c   :  { %1795 = vmatprep.subr.mxu0 %v2265_v32 }
  0x4d   :  { %1796 = vmatpush3.msra.mxu0 %v2305_v2 }
  0x4e   :  { %1797 = vmatprep.subr.mxu0 %v2265_v32 }
  0x4f   :  { %1798 = vmatpush3.msra.mxu0 %v2300_v1 }
  0x50   :  { %1799 = vmatprep.subr.mxu0 %v2265_v32 }
  0x51   :  { %1800 = vmatpush3.msra.mxu0 %v2295_v0 }
  0x52   :  { %1839 = vmatprep.subr.mxu0 %v2265_v32 }
  0xf2   :  { %v271_v34 = vpop.f32.mrf.mxu0 }
  0xf3   :  { %v275_v35 = vadd.f32 %v271_v34, %v204_v33 }
  0xf4   :  { %v1733_v36 = vpop.f32.mrf.mxu0 }
  0xf5   :  { %v276_v37 = vmax.f32 %v275_v35, 0.0 }
  0xf7   :  { %1767 = vmatmul.mubr.f32.vlgmr.msra.gmra.mxu1 %v276_v37  ;;  %1802 = vmatmul.mubr.f32.vlgmr.msra.gmra.mxu0 %v276_v37 }
  0xf8   :  { %1805 = vmatpush3.msra.mxu1 %v2450_v31  ;;  %1840 = vmatpush3.msra.mxu0 %v2370_v15 }
  0xf9   :  { %1806 = vmatprep.subr.mxu1 %v2265_v32  ;;  %1841 = vmatprep.subr.mxu0 %v2265_v32 }
  0xfa   :  { %1807 = vmatpush3.msra.mxu1 %v2445_v30  ;;  %1842 = vmatpush3.msra.mxu0 %v2365_v14 }
  0xfb   :  { %1808 = vmatprep.subr.mxu1 %v2265_v32  ;;  %1843 = vmatprep.subr.mxu0 %v2265_v32 }
  0xfc   :  { %1809 = vmatpush3.msra.mxu1 %v2440_v29  ;;  %1844 = vmatpush3.msra.mxu0 %v2360_v13 }
  0xfd   :  { %1810 = vmatprep.subr.mxu1 %v2265_v32  ;;  %1845 = vmatprep.subr.mxu0 %v2265_v32 }
  0xfe   :  { %1811 = vmatpush3.msra.mxu1 %v2435_v28  ;;  %1846 = vmatpush3.msra.mxu0 %v2355_v12 }
  0xff   :  { %1812 = vmatprep.subr.mxu1 %v2265_v32  ;;  %1847 = vmatprep.subr.mxu0 %v2265_v32 }
 0x100   :  { %1813 = vmatpush3.msra.mxu1 %v2430_v27  ;;  %1848 = vmatpush3.msra.mxu0 %v2350_v11 }
 0x101   :  { %1814 = vmatprep.subr.mxu1 %v2265_v32  ;;  %1849 = vmatprep.subr.mxu0 %v2265_v32 }
 0x102   :  { %1815 = vmatpush3.msra.mxu1 %v2425_v26  ;;  %1850 = vmatpush3.msra.mxu0 %v2345_v10 }
 0x103   :  { %1816 = vmatprep.subr.mxu1 %v2265_v32  ;;  %1851 = vmatprep.subr.mxu0 %v2265_v32 }
 0x104   :  { %1817 = vmatpush3.msra.mxu1 %v2420_v25  ;;  %1852 = vmatpush3.msra.mxu0 %v2340_v9 }
 0x105   :  { %1818 = vmatprep.subr.mxu1 %v2265_v32  ;;  %1853 = vmatprep.subr.mxu0 %v2265_v32 }
 0x106   :  { %1819 = vmatpush3.msra.mxu1 %v2415_v24  ;;  %1854 = vmatpush3.msra.mxu0 %v2335_v8 }
 0x107   :  { %1820 = vmatprep.subr.mxu1 %v2265_v32  ;;  %1855 = vmatprep.subr.mxu0 %v2265_v32 }
 0x108   :  { %1821 = vmatpush3.msra.mxu1 %v2410_v23  ;;  %1856 = vmatpush3.msra.mxu0 %v2330_v7 }
 0x109   :  { %1822 = vmatprep.subr.mxu1 %v2265_v32  ;;  %1857 = vmatprep.subr.mxu0 %v2265_v32 }
 0x10a   :  { %1823 = vmatpush3.msra.mxu1 %v2405_v22  ;;  %1858 = vmatpush3.msra.mxu0 %v2325_v6 }
 0x10b   :  { %1824 = vmatprep.subr.mxu1 %v2265_v32  ;;  %1859 = vmatprep.subr.mxu0 %v2265_v32 }
 0x10c   :  { %1825 = vmatpush3.msra.mxu1 %v2400_v21  ;;  %1860 = vmatpush3.msra.mxu0 %v2320_v5 }
 0x10d   :  { %1826 = vmatprep.subr.mxu1 %v2265_v32  ;;  %1861 = vmatprep.subr.mxu0 %v2265_v32 }
 0x10e   :  { %1827 = vmatpush3.msra.mxu1 %v2395_v20  ;;  %1862 = vmatpush3.msra.mxu0 %v2315_v4 }
 0x10f   :  { %1828 = vmatprep.subr.mxu1 %v2265_v32  ;;  %1863 = vmatprep.subr.mxu0 %v2265_v32 }
 0x110   :  { %1829 = vmatpush3.msra.mxu1 %v2390_v19  ;;  %1864 = vmatpush3.msra.mxu0 %v2310_v3 }
 0x111   :  { %1830 = vmatprep.subr.mxu1 %v2265_v32  ;;  %1865 = vmatprep.subr.mxu0 %v2265_v32 }
 0x112   :  { %1831 = vmatpush3.msra.mxu1 %v2385_v18  ;;  %1866 = vmatpush3.msra.mxu0 %v2305_v2 }
 0x113   :  { %1832 = vmatprep.subr.mxu1 %v2265_v32  ;;  %1867 = vmatprep.subr.mxu0 %v2265_v32 }
 0x114   :  { %1833 = vmatpush3.msra.mxu1 %v2380_v17  ;;  %1868 = vmatpush3.msra.mxu0 %v2300_v1 }
 0x115   :  { %1834 = vmatprep.subr.mxu1 %v2265_v32  ;;  %1869 = vmatprep.subr.mxu0 %v2265_v32 }
 0x116   :  { %1835 = vmatpush3.msra.mxu1 %v2375_v16  ;;  %1836 = vmatprep.mubr.msk.f32.mxu1 %vm2266_vm0, %v2265_v32 }
 0x117   :  { %1870 = vmatpush3.msra.mxu0 %v2295_v0  ;;  %1871 = vmatprep.mubr.msk.f32.mxu0 %vm2266_vm0, %v2265_v32 }
 0x118   :  { %1874 = vmatprep.subr.mxu1 %v2265_v32  ;;  %1909 = vmatprep.subr.mxu0 %v2265_v32 }
 0x1b7   :  { %v349_v40 = vpop.f32.mrf.mxu1  ;;  %v422_v41 = vpop.f32.mrf.mxu0 }
 0x1b8   :  { %v350_v42 = vadd.f32 %v2631_v38, %v349_v40  ;;  %v426_v43 = vadd.f32 %v1411_v39, %v422_v41  ;;  %v1419_v41 = vld [vmem:[%s3058_s0 + $0x28] sm:$0xff] }
 0x1b9   :  { %v1768_v44 = vpop.f32.mrf.mxu1  ;;  %v1803_v45 = vpop.f32.mrf.mxu0 }
 0x1ba   :  { %353 = vst [vmem:[%s3062_s4] sm:$0xff] %v350_v42  ;;  %v427_v46 = vmax.f32 %v426_v43, 0.0 }
 0x1bc   :  { %1837 = vmatmul.mubr.f32.vlgmr.msra.gmra.mxu1 %v427_v46  ;;  %1872 = vmatmul.mubr.f32.vlgmr.msra.gmra.mxu0 %v427_v46 }
 0x1bd   :  { %1875 = vmatpush3.msra.mxu1 %v2450_v31  ;;  %1910 = vmatpush3.msra.mxu0 %v2370_v15 }
 0x1be   :  { %1876 = vmatprep.subr.mxu1 %v2265_v32  ;;  %1911 = vmatprep.subr.mxu0 %v2265_v32 }
 0x1bf   :  { %1877 = vmatpush3.msra.mxu1 %v2445_v30  ;;  %1912 = vmatpush3.msra.mxu0 %v2365_v14 }
 0x1c0   :  { %1878 = vmatprep.subr.mxu1 %v2265_v32  ;;  %1913 = vmatprep.subr.mxu0 %v2265_v32 }
 0x1c1   :  { %1879 = vmatpush3.msra.mxu1 %v2440_v29  ;;  %1914 = vmatpush3.msra.mxu0 %v2360_v13 }
 0x1c2   :  { %1880 = vmatprep.subr.mxu1 %v2265_v32  ;;  %1915 = vmatprep.subr.mxu0 %v2265_v32 }
 0x1c3   :  { %1881 = vmatpush3.msra.mxu1 %v2435_v28  ;;  %1916 = vmatpush3.msra.mxu0 %v2355_v12 }
 0x1c4   :  { %1882 = vmatprep.subr.mxu1 %v2265_v32  ;;  %1917 = vmatprep.subr.mxu0 %v2265_v32 }
 0x1c5   :  { %1883 = vmatpush3.msra.mxu1 %v2430_v27  ;;  %1918 = vmatpush3.msra.mxu0 %v2350_v11 }
 0x1c6   :  { %1884 = vmatprep.subr.mxu1 %v2265_v32  ;;  %1919 = vmatprep.subr.mxu0 %v2265_v32 }
 0x1c7   :  { %1885 = vmatpush3.msra.mxu1 %v2425_v26  ;;  %1920 = vmatpush3.msra.mxu0 %v2345_v10 }
 0x1c8   :  { %1886 = vmatprep.subr.mxu1 %v2265_v32  ;;  %1921 = vmatprep.subr.mxu0 %v2265_v32 }
 0x1c9   :  { %1887 = vmatpush3.msra.mxu1 %v2420_v25  ;;  %1922 = vmatpush3.msra.mxu0 %v2340_v9 }
 0x1ca   :  { %1888 = vmatprep.subr.mxu1 %v2265_v32  ;;  %1923 = vmatprep.subr.mxu0 %v2265_v32 }
 0x1cb   :  { %1889 = vmatpush3.msra.mxu1 %v2415_v24  ;;  %1924 = vmatpush3.msra.mxu0 %v2335_v8 }
 0x1cc   :  { %1890 = vmatprep.subr.mxu1 %v2265_v32  ;;  %1925 = vmatprep.subr.mxu0 %v2265_v32 }
 0x1cd   :  { %1891 = vmatpush3.msra.mxu1 %v2410_v23  ;;  %1926 = vmatpush3.msra.mxu0 %v2330_v7 }
 0x1ce   :  { %1892 = vmatprep.subr.mxu1 %v2265_v32  ;;  %1927 = vmatprep.subr.mxu0 %v2265_v32 }
 0x1cf   :  { %1893 = vmatpush3.msra.mxu1 %v2405_v22  ;;  %1928 = vmatpush3.msra.mxu0 %v2325_v6 }
 0x1d0   :  { %1894 = vmatprep.subr.mxu1 %v2265_v32  ;;  %1929 = vmatprep.subr.mxu0 %v2265_v32 }
 0x1d1   :  { %1895 = vmatpush3.msra.mxu1 %v2400_v21  ;;  %1930 = vmatpush3.msra.mxu0 %v2320_v5 }
 0x1d2   :  { %1896 = vmatprep.subr.mxu1 %v2265_v32  ;;  %1931 = vmatprep.subr.mxu0 %v2265_v32 }
 0x1d3   :  { %1897 = vmatpush3.msra.mxu1 %v2395_v20  ;;  %1932 = vmatpush3.msra.mxu0 %v2315_v4 }
 0x1d4   :  { %1898 = vmatprep.subr.mxu1 %v2265_v32  ;;  %1933 = vmatprep.subr.mxu0 %v2265_v32 }
 0x1d5   :  { %1899 = vmatpush3.msra.mxu1 %v2390_v19  ;;  %1934 = vmatpush3.msra.mxu0 %v2310_v3 }
 0x1d6   :  { %1900 = vmatprep.subr.mxu1 %v2265_v32  ;;  %1935 = vmatprep.subr.mxu0 %v2265_v32 }
 0x1d7   :  { %1901 = vmatpush3.msra.mxu1 %v2385_v18  ;;  %1936 = vmatpush3.msra.mxu0 %v2305_v2 }
 0x1d8   :  { %1902 = vmatprep.subr.mxu1 %v2265_v32  ;;  %1937 = vmatprep.subr.mxu0 %v2265_v32 }
 0x1d9   :  { %1903 = vmatpush3.msra.mxu1 %v2380_v17  ;;  %1938 = vmatpush3.msra.mxu0 %v2300_v1 }
 0x1da   :  { %1904 = vmatprep.subr.mxu1 %v2265_v32  ;;  %1939 = vmatprep.subr.mxu0 %v2265_v32 }
 0x1db   :  { %1905 = vmatpush3.msra.mxu1 %v2375_v16  ;;  %1906 = vmatprep.mubr.msk.f32.mxu1 %vm2266_vm0, %v2265_v32 }
 0x1dc   :  { %1940 = vmatpush3.msra.mxu0 %v2295_v0  ;;  %1941 = vmatprep.mubr.msk.f32.mxu0 %vm2266_vm0, %v2265_v32 }
 0x1dd   :  { %1944 = vmatprep.subr.mxu1 %v2265_v32  ;;  %1979 = vmatprep.subr.mxu0 %v2265_v32 }
 0x27c   :  { %v494_v48 = vpop.f32.mrf.mxu1  ;;  %v568_v49 = vpop.f32.mrf.mxu0 }
 0x27d   :  { %v495_v50 = vadd.f32 %v2631_v38, %v494_v48  ;;  %v572_v51 = vadd.f32 %v1413_v47, %v568_v49 }
 0x27e   :  { %v1838_v52 = vpop.f32.mrf.mxu1  ;;  %v1873_v53 = vpop.f32.mrf.mxu0 }
 0x27f   :  { %1412 = vst [vmem:[%s3062_s4 + $0x8] sm:$0xff] %v495_v50  ;;  %v573_v54 = vmax.f32 %v572_v51, 0.0 }
 0x281   :  { %1907 = vmatmul.mubr.f32.vlgmr.msra.gmra.mxu1 %v573_v54  ;;  %1942 = vmatmul.mubr.f32.vlgmr.msra.gmra.mxu0 %v573_v54 }
 0x282   :  { %1945 = vmatpush3.msra.mxu1 %v2450_v31  ;;  %1980 = vmatpush3.msra.mxu0 %v2370_v15 }
 0x283   :  { %1946 = vmatprep.subr.mxu1 %v2265_v32  ;;  %1981 = vmatprep.subr.mxu0 %v2265_v32 }
 0x284   :  { %1947 = vmatpush3.msra.mxu1 %v2445_v30  ;;  %1982 = vmatpush3.msra.mxu0 %v2365_v14 }
 0x285   :  { %1948 = vmatprep.subr.mxu1 %v2265_v32  ;;  %1983 = vmatprep.subr.mxu0 %v2265_v32 }
 0x286   :  { %1949 = vmatpush3.msra.mxu1 %v2440_v29  ;;  %1984 = vmatpush3.msra.mxu0 %v2360_v13 }
 0x287   :  { %1950 = vmatprep.subr.mxu1 %v2265_v32  ;;  %1985 = vmatprep.subr.mxu0 %v2265_v32 }
 0x288   :  { %1951 = vmatpush3.msra.mxu1 %v2435_v28  ;;  %1986 = vmatpush3.msra.mxu0 %v2355_v12 }
 0x289   :  { %1952 = vmatprep.subr.mxu1 %v2265_v32  ;;  %1987 = vmatprep.subr.mxu0 %v2265_v32 }
 0x28a   :  { %1953 = vmatpush3.msra.mxu1 %v2430_v27  ;;  %1988 = vmatpush3.msra.mxu0 %v2350_v11 }
 0x28b   :  { %1954 = vmatprep.subr.mxu1 %v2265_v32  ;;  %1989 = vmatprep.subr.mxu0 %v2265_v32 }
 0x28c   :  { %1955 = vmatpush3.msra.mxu1 %v2425_v26  ;;  %1990 = vmatpush3.msra.mxu0 %v2345_v10 }
 0x28d   :  { %1956 = vmatprep.subr.mxu1 %v2265_v32  ;;  %1991 = vmatprep.subr.mxu0 %v2265_v32 }
 0x28e   :  { %1957 = vmatpush3.msra.mxu1 %v2420_v25  ;;  %1992 = vmatpush3.msra.mxu0 %v2340_v9 }
 0x28f   :  { %1958 = vmatprep.subr.mxu1 %v2265_v32  ;;  %1993 = vmatprep.subr.mxu0 %v2265_v32 }
 0x290   :  { %1959 = vmatpush3.msra.mxu1 %v2415_v24  ;;  %1994 = vmatpush3.msra.mxu0 %v2335_v8 }
 0x291   :  { %1960 = vmatprep.subr.mxu1 %v2265_v32  ;;  %1995 = vmatprep.subr.mxu0 %v2265_v32 }
 0x292   :  { %1961 = vmatpush3.msra.mxu1 %v2410_v23  ;;  %1996 = vmatpush3.msra.mxu0 %v2330_v7 }
 0x293   :  { %1962 = vmatprep.subr.mxu1 %v2265_v32  ;;  %1997 = vmatprep.subr.mxu0 %v2265_v32 }
 0x294   :  { %1963 = vmatpush3.msra.mxu1 %v2405_v22  ;;  %1998 = vmatpush3.msra.mxu0 %v2325_v6 }
 0x295   :  { %1964 = vmatprep.subr.mxu1 %v2265_v32  ;;  %1999 = vmatprep.subr.mxu0 %v2265_v32 }
 0x296   :  { %1965 = vmatpush3.msra.mxu1 %v2400_v21  ;;  %2000 = vmatpush3.msra.mxu0 %v2320_v5 }
 0x297   :  { %1966 = vmatprep.subr.mxu1 %v2265_v32  ;;  %2001 = vmatprep.subr.mxu0 %v2265_v32 }
 0x298   :  { %1967 = vmatpush3.msra.mxu1 %v2395_v20  ;;  %2002 = vmatpush3.msra.mxu0 %v2315_v4 }
 0x299   :  { %1968 = vmatprep.subr.mxu1 %v2265_v32  ;;  %2003 = vmatprep.subr.mxu0 %v2265_v32 }
 0x29a   :  { %1969 = vmatpush3.msra.mxu1 %v2390_v19  ;;  %2004 = vmatpush3.msra.mxu0 %v2310_v3 }
 0x29b   :  { %1970 = vmatprep.subr.mxu1 %v2265_v32  ;;  %2005 = vmatprep.subr.mxu0 %v2265_v32 }
 0x29c   :  { %1971 = vmatpush3.msra.mxu1 %v2385_v18  ;;  %2006 = vmatpush3.msra.mxu0 %v2305_v2 }
 0x29d   :  { %1972 = vmatprep.subr.mxu1 %v2265_v32  ;;  %2007 = vmatprep.subr.mxu0 %v2265_v32 }
 0x29e   :  { %1973 = vmatpush3.msra.mxu1 %v2380_v17  ;;  %2008 = vmatpush3.msra.mxu0 %v2300_v1 }
 0x29f   :  { %1974 = vmatprep.subr.mxu1 %v2265_v32  ;;  %2009 = vmatprep.subr.mxu0 %v2265_v32 }
 0x2a0   :  { %1975 = vmatpush3.msra.mxu1 %v2375_v16  ;;  %1976 = vmatprep.mubr.msk.f32.mxu1 %vm2266_vm0, %v2265_v32 }
 0x2a1   :  { %2010 = vmatpush3.msra.mxu0 %v2295_v0  ;;  %2011 = vmatprep.mubr.msk.f32.mxu0 %vm2266_vm0, %v2265_v32 }
 0x2a2   :  { %2014 = vmatprep.subr.mxu1 %v2265_v32  ;;  %2049 = vmatprep.subr.mxu0 %v2265_v32 }
 0x341   :  { %v640_v56 = vpop.f32.mrf.mxu1  ;;  %v714_v57 = vpop.f32.mrf.mxu0 }
 0x342   :  { %v641_v58 = vadd.f32 %v2631_v38, %v640_v56  ;;  %v718_v59 = vadd.f32 %v1415_v55, %v714_v57 }
 0x343   :  { %v1908_v60 = vpop.f32.mrf.mxu1  ;;  %v1943_v61 = vpop.f32.mrf.mxu0 }
 0x344   :  { %1414 = vst [vmem:[%s3062_s4 + $0x10] sm:$0xff] %v641_v58  ;;  %v719_v62 = vmax.f32 %v718_v59, 0.0 }
 0x346   :  { %1977 = vmatmul.mubr.f32.vlgmr.msra.gmra.mxu1 %v719_v62  ;;  %2012 = vmatmul.mubr.f32.vlgmr.msra.gmra.mxu0 %v719_v62 }
 0x347   :  { %2015 = vmatpush3.msra.mxu1 %v2450_v31  ;;  %2050 = vmatpush3.msra.mxu0 %v2370_v15 }
 0x348   :  { %2016 = vmatprep.subr.mxu1 %v2265_v32  ;;  %2051 = vmatprep.subr.mxu0 %v2265_v32 }
 0x349   :  { %2017 = vmatpush3.msra.mxu1 %v2445_v30  ;;  %2052 = vmatpush3.msra.mxu0 %v2365_v14 }
 0x34a   :  { %2018 = vmatprep.subr.mxu1 %v2265_v32  ;;  %2053 = vmatprep.subr.mxu0 %v2265_v32 }
 0x34b   :  { %2019 = vmatpush3.msra.mxu1 %v2440_v29  ;;  %2054 = vmatpush3.msra.mxu0 %v2360_v13 }
 0x34c   :  { %2020 = vmatprep.subr.mxu1 %v2265_v32  ;;  %2055 = vmatprep.subr.mxu0 %v2265_v32 }
 0x34d   :  { %2021 = vmatpush3.msra.mxu1 %v2435_v28  ;;  %2056 = vmatpush3.msra.mxu0 %v2355_v12 }
 0x34e   :  { %2022 = vmatprep.subr.mxu1 %v2265_v32  ;;  %2057 = vmatprep.subr.mxu0 %v2265_v32 }
 0x34f   :  { %2023 = vmatpush3.msra.mxu1 %v2430_v27  ;;  %2058 = vmatpush3.msra.mxu0 %v2350_v11 }
 0x350   :  { %2024 = vmatprep.subr.mxu1 %v2265_v32  ;;  %2059 = vmatprep.subr.mxu0 %v2265_v32 }
 0x351   :  { %2025 = vmatpush3.msra.mxu1 %v2425_v26  ;;  %2060 = vmatpush3.msra.mxu0 %v2345_v10 }
 0x352   :  { %2026 = vmatprep.subr.mxu1 %v2265_v32  ;;  %2061 = vmatprep.subr.mxu0 %v2265_v32 }
 0x353   :  { %2027 = vmatpush3.msra.mxu1 %v2420_v25  ;;  %2062 = vmatpush3.msra.mxu0 %v2340_v9 }
 0x354   :  { %2028 = vmatprep.subr.mxu1 %v2265_v32  ;;  %2063 = vmatprep.subr.mxu0 %v2265_v32 }
 0x355   :  { %2029 = vmatpush3.msra.mxu1 %v2415_v24  ;;  %2064 = vmatpush3.msra.mxu0 %v2335_v8 }
 0x356   :  { %2030 = vmatprep.subr.mxu1 %v2265_v32  ;;  %2065 = vmatprep.subr.mxu0 %v2265_v32 }
 0x357   :  { %2031 = vmatpush3.msra.mxu1 %v2410_v23  ;;  %2066 = vmatpush3.msra.mxu0 %v2330_v7 }
 0x358   :  { %2032 = vmatprep.subr.mxu1 %v2265_v32  ;;  %2067 = vmatprep.subr.mxu0 %v2265_v32 }
 0x359   :  { %2033 = vmatpush3.msra.mxu1 %v2405_v22  ;;  %2068 = vmatpush3.msra.mxu0 %v2325_v6 }
 0x35a   :  { %2034 = vmatprep.subr.mxu1 %v2265_v32  ;;  %2069 = vmatprep.subr.mxu0 %v2265_v32 }
 0x35b   :  { %2035 = vmatpush3.msra.mxu1 %v2400_v21  ;;  %2070 = vmatpush3.msra.mxu0 %v2320_v5 }
 0x35c   :  { %2036 = vmatprep.subr.mxu1 %v2265_v32  ;;  %2071 = vmatprep.subr.mxu0 %v2265_v32 }
 0x35d   :  { %2037 = vmatpush3.msra.mxu1 %v2395_v20  ;;  %2072 = vmatpush3.msra.mxu0 %v2315_v4 }
 0x35e   :  { %2038 = vmatprep.subr.mxu1 %v2265_v32  ;;  %2073 = vmatprep.subr.mxu0 %v2265_v32 }
 0x35f   :  { %2039 = vmatpush3.msra.mxu1 %v2390_v19  ;;  %2074 = vmatpush3.msra.mxu0 %v2310_v3 }
 0x360   :  { %2040 = vmatprep.subr.mxu1 %v2265_v32  ;;  %2075 = vmatprep.subr.mxu0 %v2265_v32 }
 0x361   :  { %2041 = vmatpush3.msra.mxu1 %v2385_v18  ;;  %2076 = vmatpush3.msra.mxu0 %v2305_v2 }
 0x362   :  { %2042 = vmatprep.subr.mxu1 %v2265_v32  ;;  %2077 = vmatprep.subr.mxu0 %v2265_v32 }
 0x363   :  { %2043 = vmatpush3.msra.mxu1 %v2380_v17  ;;  %2078 = vmatpush3.msra.mxu0 %v2300_v1 }
 0x364   :  { %2044 = vmatprep.subr.mxu1 %v2265_v32  ;;  %2079 = vmatprep.subr.mxu0 %v2265_v32 }
 0x365   :  { %2045 = vmatpush3.msra.mxu1 %v2375_v16  ;;  %2046 = vmatprep.mubr.msk.f32.mxu1 %vm2266_vm0, %v2265_v32 }
 0x366   :  { %2080 = vmatpush3.msra.mxu0 %v2295_v0  ;;  %2081 = vmatprep.mubr.msk.f32.mxu0 %vm2266_vm0, %v2265_v32 }
 0x367   :  { %2084 = vmatprep.subr.mxu1 %v2265_v32  ;;  %2119 = vmatprep.subr.mxu0 %v2265_v32 }
 0x406   :  { %v786_v33 = vpop.f32.mrf.mxu1  ;;  %v860_v34 = vpop.f32.mrf.mxu0 }
 0x407   :  { %v787_v35 = vadd.f32 %v2631_v38, %v786_v33  ;;  %v864_v36 = vadd.f32 %v1417_v63, %v860_v34 }
 0x408   :  { %v1978_v37 = vpop.f32.mrf.mxu1  ;;  %v2013_v39 = vpop.f32.mrf.mxu0 }
 0x409   :  { %1416 = vst [vmem:[%s3062_s4 + $0x18] sm:$0xff] %v787_v35  ;;  %v865_v40 = vmax.f32 %v864_v36, 0.0 }
 0x40b   :  { %2047 = vmatmul.mubr.f32.vlgmr.msra.gmra.mxu1 %v865_v40  ;;  %2082 = vmatmul.mubr.f32.vlgmr.msra.gmra.mxu0 %v865_v40 }
 0x40c   :  { %2085 = vmatpush3.msra.mxu1 %v2450_v31  ;;  %2120 = vmatpush3.msra.mxu0 %v2370_v15 }
 0x40d   :  { %2086 = vmatprep.subr.mxu1 %v2265_v32  ;;  %2121 = vmatprep.subr.mxu0 %v2265_v32 }
 0x40e   :  { %2087 = vmatpush3.msra.mxu1 %v2445_v30  ;;  %2122 = vmatpush3.msra.mxu0 %v2365_v14 }
 0x40f   :  { %2088 = vmatprep.subr.mxu1 %v2265_v32  ;;  %2123 = vmatprep.subr.mxu0 %v2265_v32 }
 0x410   :  { %2089 = vmatpush3.msra.mxu1 %v2440_v29  ;;  %2124 = vmatpush3.msra.mxu0 %v2360_v13 }
 0x411   :  { %2090 = vmatprep.subr.mxu1 %v2265_v32  ;;  %2125 = vmatprep.subr.mxu0 %v2265_v32 }
 0x412   :  { %2091 = vmatpush3.msra.mxu1 %v2435_v28  ;;  %2126 = vmatpush3.msra.mxu0 %v2355_v12 }
 0x413   :  { %2092 = vmatprep.subr.mxu1 %v2265_v32  ;;  %2127 = vmatprep.subr.mxu0 %v2265_v32 }
 0x414   :  { %2093 = vmatpush3.msra.mxu1 %v2430_v27  ;;  %2128 = vmatpush3.msra.mxu0 %v2350_v11 }
 0x415   :  { %2094 = vmatprep.subr.mxu1 %v2265_v32  ;;  %2129 = vmatprep.subr.mxu0 %v2265_v32 }
 0x416   :  { %2095 = vmatpush3.msra.mxu1 %v2425_v26  ;;  %2130 = vmatpush3.msra.mxu0 %v2345_v10 }
 0x417   :  { %2096 = vmatprep.subr.mxu1 %v2265_v32  ;;  %2131 = vmatprep.subr.mxu0 %v2265_v32 }
 0x418   :  { %2097 = vmatpush3.msra.mxu1 %v2420_v25  ;;  %2132 = vmatpush3.msra.mxu0 %v2340_v9 }
 0x419   :  { %2098 = vmatprep.subr.mxu1 %v2265_v32  ;;  %2133 = vmatprep.subr.mxu0 %v2265_v32 }
 0x41a   :  { %2099 = vmatpush3.msra.mxu1 %v2415_v24  ;;  %2134 = vmatpush3.msra.mxu0 %v2335_v8 }
 0x41b   :  { %2100 = vmatprep.subr.mxu1 %v2265_v32  ;;  %2135 = vmatprep.subr.mxu0 %v2265_v32 }
 0x41c   :  { %2101 = vmatpush3.msra.mxu1 %v2410_v23  ;;  %2136 = vmatpush3.msra.mxu0 %v2330_v7 }
 0x41d   :  { %2102 = vmatprep.subr.mxu1 %v2265_v32  ;;  %2137 = vmatprep.subr.mxu0 %v2265_v32 }
 0x41e   :  { %2103 = vmatpush3.msra.mxu1 %v2405_v22  ;;  %2138 = vmatpush3.msra.mxu0 %v2325_v6 }
 0x41f   :  { %2104 = vmatprep.subr.mxu1 %v2265_v32  ;;  %2139 = vmatprep.subr.mxu0 %v2265_v32 }
 0x420   :  { %2105 = vmatpush3.msra.mxu1 %v2400_v21  ;;  %2140 = vmatpush3.msra.mxu0 %v2320_v5 }
 0x421   :  { %2106 = vmatprep.subr.mxu1 %v2265_v32  ;;  %2141 = vmatprep.subr.mxu0 %v2265_v32 }
 0x422   :  { %2107 = vmatpush3.msra.mxu1 %v2395_v20  ;;  %2142 = vmatpush3.msra.mxu0 %v2315_v4 }
 0x423   :  { %2108 = vmatprep.subr.mxu1 %v2265_v32  ;;  %2143 = vmatprep.subr.mxu0 %v2265_v32 }
 0x424   :  { %2109 = vmatpush3.msra.mxu1 %v2390_v19  ;;  %2144 = vmatpush3.msra.mxu0 %v2310_v3 }
 0x425   :  { %2110 = vmatprep.subr.mxu1 %v2265_v32  ;;  %2145 = vmatprep.subr.mxu0 %v2265_v32 }
 0x426   :  { %2111 = vmatpush3.msra.mxu1 %v2385_v18  ;;  %2146 = vmatpush3.msra.mxu0 %v2305_v2 }
 0x427   :  { %2112 = vmatprep.subr.mxu1 %v2265_v32  ;;  %2147 = vmatprep.subr.mxu0 %v2265_v32 }
 0x428   :  { %2113 = vmatpush3.msra.mxu1 %v2380_v17  ;;  %2148 = vmatpush3.msra.mxu0 %v2300_v1 }
 0x429   :  { %2114 = vmatprep.subr.mxu1 %v2265_v32  ;;  %2149 = vmatprep.subr.mxu0 %v2265_v32 }
 0x42a   :  { %2115 = vmatpush3.msra.mxu1 %v2375_v16  ;;  %2116 = vmatprep.mubr.msk.f32.mxu1 %vm2266_vm0, %v2265_v32 }
 0x42b   :  { %2150 = vmatpush3.msra.mxu0 %v2295_v0  ;;  %2151 = vmatprep.mubr.msk.f32.mxu0 %vm2266_vm0, %v2265_v32 }
 0x42c   :  { %2154 = vmatprep.subr.mxu1 %v2265_v32  ;;  %2189 = vmatprep.subr.mxu0 %v2265_v32 }
 0x4cb   :  { %v932_v42 = vpop.f32.mrf.mxu1  ;;  %v1006_v43 = vpop.f32.mrf.mxu0 }
 0x4cc   :  { %v933_v44 = vadd.f32 %v2631_v38, %v932_v42  ;;  %v1010_v45 = vadd.f32 %v1419_v41, %v1006_v43 }
 0x4cd   :  { %v2048_v46 = vpop.f32.mrf.mxu1  ;;  %v2083_v47 = vpop.f32.mrf.mxu0 }
 0x4ce   :  { %1418 = vst [vmem:[%s3062_s4 + $0x20] sm:$0xff] %v933_v44  ;;  %v1011_v48 = vmax.f32 %v1010_v45, 0.0 }
 0x4d0   :  { %2117 = vmatmul.mubr.f32.vlgmr.msra.gmra.mxu1 %v1011_v48  ;;  %2152 = vmatmul.mubr.f32.vlgmr.msra.gmra.mxu0 %v1011_v48 }
 0x4d1   :  { %2155 = vmatpush3.msra.mxu1 %v2450_v31  ;;  %2190 = vmatpush3.msra.mxu0 %v2370_v15 }
 0x4d2   :  { %2156 = vmatprep.subr.mxu1 %v2265_v32  ;;  %2191 = vmatprep.subr.mxu0 %v2265_v32 }
 0x4d3   :  { %2157 = vmatpush3.msra.mxu1 %v2445_v30  ;;  %2192 = vmatpush3.msra.mxu0 %v2365_v14 }
 0x4d4   :  { %2158 = vmatprep.subr.mxu1 %v2265_v32  ;;  %2193 = vmatprep.subr.mxu0 %v2265_v32 }
 0x4d5   :  { %2159 = vmatpush3.msra.mxu1 %v2440_v29  ;;  %2194 = vmatpush3.msra.mxu0 %v2360_v13 }
 0x4d6   :  { %2160 = vmatprep.subr.mxu1 %v2265_v32  ;;  %2195 = vmatprep.subr.mxu0 %v2265_v32 }
 0x4d7   :  { %2161 = vmatpush3.msra.mxu1 %v2435_v28  ;;  %2196 = vmatpush3.msra.mxu0 %v2355_v12 }
 0x4d8   :  { %2162 = vmatprep.subr.mxu1 %v2265_v32  ;;  %2197 = vmatprep.subr.mxu0 %v2265_v32 }
 0x4d9   :  { %2163 = vmatpush3.msra.mxu1 %v2430_v27  ;;  %2198 = vmatpush3.msra.mxu0 %v2350_v11 }
 0x4da   :  { %2164 = vmatprep.subr.mxu1 %v2265_v32  ;;  %2199 = vmatprep.subr.mxu0 %v2265_v32 }
 0x4db   :  { %2165 = vmatpush3.msra.mxu1 %v2425_v26  ;;  %2200 = vmatpush3.msra.mxu0 %v2345_v10 }
 0x4dc   :  { %2166 = vmatprep.subr.mxu1 %v2265_v32  ;;  %2201 = vmatprep.subr.mxu0 %v2265_v32 }
 0x4dd   :  { %2167 = vmatpush3.msra.mxu1 %v2420_v25  ;;  %2202 = vmatpush3.msra.mxu0 %v2340_v9 }
 0x4de   :  { %2168 = vmatprep.subr.mxu1 %v2265_v32  ;;  %2203 = vmatprep.subr.mxu0 %v2265_v32 }
 0x4df   :  { %2169 = vmatpush3.msra.mxu1 %v2415_v24  ;;  %2204 = vmatpush3.msra.mxu0 %v2335_v8  ;;  %v1423_v8 = vld [vmem:[%s3058_s0 + $0x38] sm:$0xff] }
 0x4e0   :  { %2170 = vmatprep.subr.mxu1 %v2265_v32  ;;  %2205 = vmatprep.subr.mxu0 %v2265_v32 }
 0x4e1   :  { %2171 = vmatpush3.msra.mxu1 %v2410_v23  ;;  %2206 = vmatpush3.msra.mxu0 %v2330_v7 }
 0x4e2   :  { %2172 = vmatprep.subr.mxu1 %v2265_v32  ;;  %2207 = vmatprep.subr.mxu0 %v2265_v32 }
 0x4e3   :  { %2173 = vmatpush3.msra.mxu1 %v2405_v22  ;;  %2208 = vmatpush3.msra.mxu0 %v2325_v6 }
 0x4e4   :  { %2174 = vmatprep.subr.mxu1 %v2265_v32  ;;  %2209 = vmatprep.subr.mxu0 %v2265_v32 }
 0x4e5   :  { %2175 = vmatpush3.msra.mxu1 %v2400_v21  ;;  %2210 = vmatpush3.msra.mxu0 %v2320_v5 }
 0x4e6   :  { %2176 = vmatprep.subr.mxu1 %v2265_v32  ;;  %2211 = vmatprep.subr.mxu0 %v2265_v32 }
 0x4e7   :  { %2177 = vmatpush3.msra.mxu1 %v2395_v20  ;;  %2212 = vmatpush3.msra.mxu0 %v2315_v4 }
 0x4e8   :  { %2178 = vmatprep.subr.mxu1 %v2265_v32  ;;  %2213 = vmatprep.subr.mxu0 %v2265_v32 }
 0x4e9   :  { %2179 = vmatpush3.msra.mxu1 %v2390_v19  ;;  %2214 = vmatpush3.msra.mxu0 %v2310_v3 }
 0x4ea   :  { %2180 = vmatprep.subr.mxu1 %v2265_v32  ;;  %2215 = vmatprep.subr.mxu0 %v2265_v32 }
 0x4eb   :  { %2181 = vmatpush3.msra.mxu1 %v2385_v18  ;;  %2216 = vmatpush3.msra.mxu0 %v2305_v2 }
 0x4ec   :  { %2182 = vmatprep.subr.mxu1 %v2265_v32  ;;  %2217 = vmatprep.subr.mxu0 %v2265_v32 }
 0x4ed   :  { %2183 = vmatpush3.msra.mxu1 %v2380_v17  ;;  %2218 = vmatpush3.msra.mxu0 %v2300_v1  ;;  %v1421_v1 = vld [vmem:[%s3058_s0 + $0x30] sm:$0xff] }
 0x4ee   :  { %2184 = vmatprep.subr.mxu1 %v2265_v32  ;;  %2219 = vmatprep.subr.mxu0 %v2265_v32 }
 0x4ef   :  { %2185 = vmatpush3.msra.mxu1 %v2375_v16  ;;  %2186 = vmatprep.mubr.msk.f32.mxu1 %vm2266_vm0, %v2265_v32 }
 0x4f0   :  { %2220 = vmatpush3.msra.mxu0 %v2295_v0  ;;  %2221 = vmatprep.mubr.msk.f32.mxu0 %vm2266_vm0, %v2265_v32 }
 0x4f1   :  { %2224 = vmatprep.subr.mxu1 %v2265_v32 }
 0x590   :  { %v1078_v2 = vpop.f32.mrf.mxu1  ;;  %v1152_v3 = vpop.f32.mrf.mxu0 }
 0x591   :  { %v1079_v4 = vadd.f32 %v2631_v38, %v1078_v2  ;;  %v1156_v5 = vadd.f32 %v1421_v1, %v1152_v3 }
 0x592   :  { %v2118_v6 = vpop.f32.mrf.mxu1  ;;  %v2153_v7 = vpop.f32.mrf.mxu0 }
 0x593   :  { %1420 = vst [vmem:[%s3062_s4 + $0x28] sm:$0xff] %v1079_v4  ;;  %v1157_v0 = vmax.f32 %v1156_v5, 0.0 }
 0x595   :  { %2187 = vmatmul.mubr.f32.vlgmr.msra.gmra.mxu1 %v1157_v0  ;;  %2222 = vmatmul.mubr.f32.vlgmr.msra.gmra.mxu0 %v1157_v0 }
 0x596   :  { %2225 = vmatpush3.msra.mxu1 %v2450_v31  ;;  %2256 = vmatprep.mubr.msk.f32.mxu1 %vm2266_vm0, %v2265_v32 }
 0x597   :  { %2226 = vmatprep.subr.mxu1 %v2265_v32 }
 0x598   :  { %2227 = vmatpush3.msra.mxu1 %v2445_v30 }
 0x599   :  { %2228 = vmatprep.subr.mxu1 %v2265_v32 }
 0x59a   :  { %2229 = vmatpush3.msra.mxu1 %v2440_v29 }
 0x59b   :  { %2230 = vmatprep.subr.mxu1 %v2265_v32 }
 0x59c   :  { %2231 = vmatpush3.msra.mxu1 %v2435_v28 }
 0x59d   :  { %2232 = vmatprep.subr.mxu1 %v2265_v32 }
 0x59e   :  { %2233 = vmatpush3.msra.mxu1 %v2430_v27 }
 0x59f   :  { %2234 = vmatprep.subr.mxu1 %v2265_v32 }
 0x5a0   :  { %2235 = vmatpush3.msra.mxu1 %v2425_v26 }
 0x5a1   :  { %2236 = vmatprep.subr.mxu1 %v2265_v32 }
 0x5a2   :  { %2237 = vmatpush3.msra.mxu1 %v2420_v25 }
 0x5a3   :  { %2238 = vmatprep.subr.mxu1 %v2265_v32 }
 0x5a4   :  { %2239 = vmatpush3.msra.mxu1 %v2415_v24 }
 0x5a5   :  { %2240 = vmatprep.subr.mxu1 %v2265_v32 }
 0x5a6   :  { %2241 = vmatpush3.msra.mxu1 %v2410_v23 }
 0x5a7   :  { %2242 = vmatprep.subr.mxu1 %v2265_v32 }
 0x5a8   :  { %2243 = vmatpush3.msra.mxu1 %v2405_v22 }
 0x5a9   :  { %2244 = vmatprep.subr.mxu1 %v2265_v32 }
 0x5aa   :  { %2245 = vmatpush3.msra.mxu1 %v2400_v21 }
 0x5ab   :  { %2246 = vmatprep.subr.mxu1 %v2265_v32 }
 0x5ac   :  { %2247 = vmatpush3.msra.mxu1 %v2395_v20 }
 0x5ad   :  { %2248 = vmatprep.subr.mxu1 %v2265_v32 }
 0x5ae   :  { %2249 = vmatpush3.msra.mxu1 %v2390_v19 }
 0x5af   :  { %2250 = vmatprep.subr.mxu1 %v2265_v32 }
 0x5b0   :  { %2251 = vmatpush3.msra.mxu1 %v2385_v18 }
 0x5b1   :  { %2252 = vmatprep.subr.mxu1 %v2265_v32 }
 0x5b2   :  { %2253 = vmatpush3.msra.mxu1 %v2380_v17 }
 0x5b3   :  { %2254 = vmatprep.subr.mxu1 %v2265_v32 }
 0x5b4   :  { %2255 = vmatpush3.msra.mxu1 %v2375_v16 }
 0x655   :  { %v1224_v9 = vpop.f32.mrf.mxu1  ;;  %v1298_v10 = vpop.f32.mrf.mxu0 }
 0x656   :  { %v1225_v11 = vadd.f32 %v2631_v38, %v1224_v9  ;;  %v1302_v12 = vadd.f32 %v1423_v8, %v1298_v10 }
 0x657   :  { %v2188_v13 = vpop.f32.mrf.mxu1  ;;  %v2223_v14 = vpop.f32.mrf.mxu0 }
 0x658   :  { %1422 = vst [vmem:[%s3062_s4 + $0x30] sm:$0xff] %v1225_v11  ;;  %v1303_v15 = vmax.f32 %v1302_v12, 0.0 }
 0x65a   :  { %2257 = vmatmul.mubr.f32.vlgmr.msra.gmra.mxu1 %v1303_v15 }
 0x71a   :  { %v1370_v17 = vpop.f32.mrf.mxu1 }
 0x71b   :  { %v1371_v16 = vadd.f32 %v2631_v38, %v1370_v17 }
 0x71c   :  { %v2258_v18 = vpop.f32.mrf.mxu1 }
 0x71d   :  { %1424 = vst [vmem:[%s3062_s4 + $0x38] sm:$0xff] %v1371_v16 }
 0x71e   :  { %1381 = vsyncmov [#allocation5] }
 0x721   :  { %s1382_s0 = vpop.sfrf %1381 }
 0x722   :  { %p1425_p0 = scmp.ne.s32.totalorder %s1382_s0, 0 }
 0x724   :  { %1386 = shalt.err (%p1425_p0)  }
 0x725   :  { %1388 = vsyncmov [#allocation5 + $0x1] }
 0x728   :  { %s1389_s29 = vpop.sfrf %1388 }
 0x729   :  { %p1426_p1 = scmp.ne.s32.totalorder %s1389_s29, 0 }
 0x72b   :  { %1393 = shalt.err (%p1426_p1)  }

</bundles_post_ra>
